<compile_context>
chip_gen: v7x
topology: tpu7x:2x2x1
jax: 0.10.0
libtpu: 0.0.40
codegen_flags: <defaults>
</compile_context>

<pallas_src>
import functools

import jax
import jax.numpy as jnp
from jax.experimental import pallas as pl
from jax.experimental.pallas import tpu as pltpu

HIDDEN = 256          # hidden width of the Actor MLP
OUT_PAD = 128         # lane-dense padded output width (action_dim <= OUT_PAD)
MAX_TILE_B = 1024     # rows per grid step (multiple of 16)
ROW_ALIGN = 16        # bf16 sublane packing
IN_ALIGN = 16         # pad state_dim to a multiple of this


def _round_up(x, m):
    return (x + m - 1) // m * m


def _choose_tiling(batch):
    """(tile_b, num_tiles): one max-size tile when it fits, otherwise an EVEN
    number of balanced tiles so v7x's two TensorCores both get work."""
    p = _round_up(max(batch, 1), ROW_ALIGN)
    if p <= MAX_TILE_B:
        return p, 1
    n_tiles = _round_up(-(-p // MAX_TILE_B), 2)          # even grid length >= 2
    tile_b = _round_up(-(-p // n_tiles), ROW_ALIGN)
    return tile_b, n_tiles


# ---------------------------------------------------------------------------
# Pallas kernel: 3-layer MLP  relu -> relu -> tanh * max_action
# ---------------------------------------------------------------------------
def _actor_kernel(x_ref, w1_ref, b1_ref, w2_ref, b2_ref, w3_ref, b3_ref,
                  out_ref, *, max_action):
    # bf16 operands on the MXU, f32 accumulation; epilogue math stays f32
    # (v5e has no bf16 VPU/EUP), downcast fused into the relu epilogue.
    h1 = jnp.dot(x_ref[...], w1_ref[...], preferred_element_type=jnp.float32)
    h1 = jnp.maximum(h1 + b1_ref[...], 0.0).astype(jnp.bfloat16)   # (TB, 256)

    h2 = jnp.dot(h1, w2_ref[...], preferred_element_type=jnp.float32)
    h2 = jnp.maximum(h2 + b2_ref[...], 0.0).astype(jnp.bfloat16)   # (TB, 256)

    h3 = jnp.dot(h2, w3_ref[...], preferred_element_type=jnp.float32)
    out_ref[...] = (jnp.tanh(h3 + b3_ref[...]) * max_action).astype(out_ref.dtype)


def actor_forward_padded(state, params, max_action):
    """state: (B, state_dim) f32/bf16.  Returns the padded (pB, OUT_PAD) bf16
    action slab (slice lazily at the point of use so XLA can fuse it)."""
    B, state_dim = state.shape
    in_pad = params["w1"].shape[0]

    tile_b, n_tiles = _choose_tiling(B)
    pB = tile_b * n_tiles

    # Pre-cast to bf16 and pad to a clean (pB, in_pad) slab (zero cols are inert).
    x = jnp.pad(state.astype(jnp.bfloat16),
                ((0, pB - B), (0, in_pad - state_dim)))

    def const(shape):
        # Weight / bias block: full array, same block every grid step (VMEM-resident).
        return pl.BlockSpec(shape, lambda i: (0, 0))

    kernel = functools.partial(_actor_kernel, max_action=float(max_action))
    out = pl.pallas_call(
        kernel,
        out_shape=jax.ShapeDtypeStruct((pB, OUT_PAD), jnp.bfloat16),
        grid=(n_tiles,),
        in_specs=[
            pl.BlockSpec((tile_b, in_pad), lambda i: (i, 0)),      # x tile (bf16)
            const((in_pad, HIDDEN)),                               # w1 (bf16)
            const((1, HIDDEN)),                                    # b1 (f32)
            const((HIDDEN, HIDDEN)),                               # w2 (bf16)
            const((1, HIDDEN)),                                    # b2 (f32)
            const((HIDDEN, OUT_PAD)),                              # w3 padded (bf16)
            const((1, OUT_PAD)),                                   # b3 padded (f32)
        ],
        out_specs=pl.BlockSpec((tile_b, OUT_PAD), lambda i: (i, 0)),
        compiler_params=pltpu.CompilerParams(
            dimension_semantics=("parallel",)),                    # v7x megacore
    )(x,
      params["w1"], params["b1"],
      params["w2"], params["b2"],
      params["w3"], params["b3"])
    return out


def actor_forward(state, params, max_action, action_dim):
    """Convenience wrapper matching the torch module signature: (B, action_dim) f32."""
    B = state.shape[0]
    out = actor_forward_padded(state, params, max_action)
    return out[:B, :action_dim].astype(jnp.float32)


# ---------------------------------------------------------------------------
# Parameter setup (mirrors NoisyLinearBeta.__init__ / reset_* in training mode)
# ---------------------------------------------------------------------------
def _scale_noise_beta(key, size, alpha=2.0, beta_val=2.0):
    # Beta(2,2) sample shifted to zero mean, like _scale_noise_beta in torch.
    # TODO(synk): jax.random.beta will not reproduce torch's Beta RNG stream bit-for-bit.
    return jax.random.beta(key, alpha, beta_val, shape=(size,)) - 0.5


def make_noisy_linear(key, in_features, out_features, sigma_init=0.02):
    k_wmu, k_bmu, k_ein, k_eout = jax.random.split(key, 4)
    bound = 1.0 / (in_features ** 0.5)

    weight_mu = jax.random.uniform(k_wmu, (out_features, in_features),
                                   minval=-bound, maxval=bound, dtype=jnp.float32)
    bias_mu = jax.random.uniform(k_bmu, (out_features,),
                                 minval=-bound, maxval=bound, dtype=jnp.float32)
    weight_sigma = jnp.full((out_features, in_features), sigma_init, jnp.float32)
    bias_sigma = jnp.full((out_features,), sigma_init, jnp.float32)

    eps_in = _scale_noise_beta(k_ein, in_features)
    eps_out = _scale_noise_beta(k_eout, out_features)

    # training-mode effective parameters
    w_eff = weight_mu + weight_sigma * (eps_out[:, None] * eps_in[None, :])  # (out, in)
    b_eff = bias_mu + bias_sigma * eps_out                                   # (out,)

    # kernel layout: (in, out) bf16 weight for the MXU, (1, out) f32 bias
    return w_eff.T.astype(jnp.bfloat16), b_eff[None, :].astype(jnp.float32)


def make_actor_params(key, state_dim, action_dim):
    k1, k2, k3 = jax.random.split(key, 3)
    w1, b1 = make_noisy_linear(k1, state_dim, HIDDEN)
    w2, b2 = make_noisy_linear(k2, HIDDEN, HIDDEN)
    w3, b3 = make_noisy_linear(k3, HIDDEN, action_dim)
    # Pad the ragged state_dim up to a 16-multiple (zero rows are inert) and the
    # narrow action output to a lane-dense 128-wide slab (tanh(0)*max lands in
    # discarded padding columns).
    in_pad = _round_up(state_dim, IN_ALIGN)
    w1 = jnp.pad(w1, ((0, in_pad - state_dim), (0, 0)))
    w3 = jnp.pad(w3, ((0, 0), (0, OUT_PAD - action_dim)))
    b3 = jnp.pad(b3, ((0, 0), (0, OUT_PAD - action_dim)))
    return {"w1": w1, "b1": b1, "w2": w2, "b2": b2, "w3": w3, "b3": b3}


# ---------------------------------------------------------------------------
# Reference (plain JAX, identical bf16-operand / f32-accumulate numerics)
# ---------------------------------------------------------------------------
def actor_forward_ref(state, params, max_action, action_dim):
    state_dim = state.shape[1]
    in_pad = params["w1"].shape[0]
    x = jnp.pad(state.astype(jnp.bfloat16), ((0, 0), (0, in_pad - state_dim)))
    h1 = jnp.maximum(
        jnp.dot(x, params["w1"], preferred_element_type=jnp.float32)
        + params["b1"], 0.0).astype(jnp.bfloat16)
    h2 = jnp.maximum(
        jnp.dot(h1, params["w2"], preferred_element_type=jnp.float32)
        + params["b2"], 0.0).astype(jnp.bfloat16)
    h3 = jnp.dot(h2, params["w3"], preferred_element_type=jnp.float32) + params["b3"]
    return (jnp.tanh(h3) * max_action)[:, :action_dim]


if __name__ == "__main__":
    # Hopper-v5: obs dim 11, action dim 3, max_action 1.0
    state_dim, action_dim, max_action = 11, 3, 1.0

    key = jax.random.PRNGKey(0)
    k_params, k_s1, k_s2, k_s3 = jax.random.split(key, 4)
    params = make_actor_params(k_params, state_dim, action_dim)

    def check(states, name):
        out = jax.block_until_ready(
            actor_forward(states, params, max_action, action_dim))
        ref = actor_forward_ref(states, params, max_action, action_dim)
        assert out.shape == (states.shape[0], action_dim)
        assert jnp.allclose(out, ref, atol=5e-3, rtol=5e-3), f"mismatch vs reference ({name})"

    # Per-env-step batch (single 16-row tile; launch-overhead dominated by design).
    check(jax.random.normal(k_s1, (4, state_dim), dtype=jnp.float32), "small")
    # Replay-minibatch sized batch (single 304-row tile).
    check(jax.random.normal(k_s2, (300, state_dim), dtype=jnp.float32), "medium")
    # Large batch: exercises the even 2-tile grid (608-row tiles, v7x megacore path).
    check(jax.random.normal(k_s3, (1200, state_dim), dtype=jnp.float32), "large")

    print("KERNEL_OK")
</pallas_src>

<mosaic_0001>
module attributes {stable_mosaic.version = 11 : i64} {
  func.func @_actor_kernel(%arg0: i32, %arg1: memref<16x16xbf16, #tpu.memory_space<vmem>>, %arg2: memref<16x256xbf16, #tpu.memory_space<vmem>>, %arg3: memref<1x256xf32, #tpu.memory_space<vmem>>, %arg4: memref<256x256xbf16, #tpu.memory_space<vmem>>, %arg5: memref<1x256xf32, #tpu.memory_space<vmem>>, %arg6: memref<256x128xbf16, #tpu.memory_space<vmem>>, %arg7: memref<1x128xf32, #tpu.memory_space<vmem>>, %arg8: memref<16x128xbf16, #tpu.memory_space<vmem>>) attributes {dimension_semantics = [#tpu.dimension_semantics<parallel>], iteration_bounds = array<i64: 1>, scalar_prefetch = 0 : i64, scratch_operands = 0 : i64, tpu.core_type = #tpu.core_type<tc>, window_params = [{transform_indices = @transform_0, window_bounds = array<i64: 16, 16>}, {pipeline_mode = #tpu.pipeline_mode<synchronous>, transform_indices = @transform_1, window_bounds = array<i64: 16, 256>}, {pipeline_mode = #tpu.pipeline_mode<synchronous>, transform_indices = @transform_2, window_bounds = array<i64: 1, 256>}, {pipeline_mode = #tpu.pipeline_mode<synchronous>, transform_indices = @transform_3, window_bounds = array<i64: 256, 256>}, {pipeline_mode = #tpu.pipeline_mode<synchronous>, transform_indices = @transform_4, window_bounds = array<i64: 1, 256>}, {pipeline_mode = #tpu.pipeline_mode<synchronous>, transform_indices = @transform_5, window_bounds = array<i64: 256, 128>}, {pipeline_mode = #tpu.pipeline_mode<synchronous>, transform_indices = @transform_6, window_bounds = array<i64: 1, 128>}, {transform_indices = @transform_7, window_bounds = array<i64: 16, 128>}]} {
    %c0 = arith.constant 0 : index
    %c0_0 = arith.constant 0 : index
    %0 = vector.load %arg1[%c0, %c0_0] : memref<16x16xbf16, #tpu.memory_space<vmem>>, vector<16x16xbf16>
    %c0_1 = arith.constant 0 : index
    %c0_2 = arith.constant 0 : index
    %1 = vector.load %arg2[%c0_1, %c0_2] : memref<16x256xbf16, #tpu.memory_space<vmem>>, vector<16x256xbf16>
    %cst = arith.constant dense<0.000000e+00> : vector<16x256xf32>
    %2 = tpu.matmul %0, %1, %cst {dimension_numbers = #tpu.dot_dimension_numbers<[1], [0], [0], [1], [0, 0, 1, 1], [], []>} : vector<16x16xbf16>, vector<16x256xbf16>, vector<16x256xf32> -> vector<16x256xf32>
    %c0_3 = arith.constant 0 : index
    %c0_4 = arith.constant 0 : index
    %3 = vector.load %arg3[%c0_3, %c0_4] : memref<1x256xf32, #tpu.memory_space<vmem>>, vector<1x256xf32>
    %4 = vector.broadcast %3 : vector<1x256xf32> to vector<16x256xf32>
    %5 = arith.addf %2, %4 : vector<16x256xf32>
    %cst_5 = arith.constant 0.000000e+00 : f32
    %6 = vector.broadcast %cst_5 : f32 to vector<16x256xf32>
    %7 = arith.maximumf %5, %6 : vector<16x256xf32>
    %8 = arith.truncf %7 : vector<16x256xf32> to vector<16x256xbf16>
    %c0_6 = arith.constant 0 : index
    %c0_7 = arith.constant 0 : index
    %9 = vector.load %arg4[%c0_6, %c0_7] : memref<256x256xbf16, #tpu.memory_space<vmem>>, vector<256x256xbf16>
    %cst_8 = arith.constant dense<0.000000e+00> : vector<16x256xf32>
    %10 = tpu.matmul %8, %9, %cst_8 {dimension_numbers = #tpu.dot_dimension_numbers<[1], [0], [0], [1], [0, 0, 1, 1], [], []>} : vector<16x256xbf16>, vector<256x256xbf16>, vector<16x256xf32> -> vector<16x256xf32>
    %c0_9 = arith.constant 0 : index
    %c0_10 = arith.constant 0 : index
    %11 = vector.load %arg5[%c0_9, %c0_10] : memref<1x256xf32, #tpu.memory_space<vmem>>, vector<1x256xf32>
    %12 = vector.broadcast %11 : vector<1x256xf32> to vector<16x256xf32>
    %13 = arith.addf %10, %12 : vector<16x256xf32>
    %cst_11 = arith.constant 0.000000e+00 : f32
    %14 = vector.broadcast %cst_11 : f32 to vector<16x256xf32>
    %15 = arith.maximumf %13, %14 : vector<16x256xf32>
    %16 = arith.truncf %15 : vector<16x256xf32> to vector<16x256xbf16>
    %c0_12 = arith.constant 0 : index
    %c0_13 = arith.constant 0 : index
    %17 = vector.load %arg6[%c0_12, %c0_13] : memref<256x128xbf16, #tpu.memory_space<vmem>>, vector<256x128xbf16>
    %cst_14 = arith.constant dense<0.000000e+00> : vector<16x128xf32>
    %18 = tpu.matmul %16, %17, %cst_14 {dimension_numbers = #tpu.dot_dimension_numbers<[1], [0], [0], [1], [0, 0, 1, 1], [], []>} : vector<16x256xbf16>, vector<256x128xbf16>, vector<16x128xf32> -> vector<16x128xf32>
    %c0_15 = arith.constant 0 : index
    %c0_16 = arith.constant 0 : index
    %19 = vector.load %arg7[%c0_15, %c0_16] : memref<1x128xf32, #tpu.memory_space<vmem>>, vector<1x128xf32>
    %20 = vector.broadcast %19 : vector<1x128xf32> to vector<16x128xf32>
    %21 = arith.addf %18, %20 : vector<16x128xf32>
    %22 = math.tanh %21 : vector<16x128xf32>
    %cst_17 = arith.constant 1.000000e+00 : f32
    %23 = vector.broadcast %cst_17 : f32 to vector<16x128xf32>
    %24 = arith.mulf %22, %23 : vector<16x128xf32>
    %25 = arith.truncf %24 : vector<16x128xf32> to vector<16x128xbf16>
    %c0_18 = arith.constant 0 : index
    %c0_19 = arith.constant 0 : index
    %26 = vector.load %arg8[%c0_18, %c0_19] : memref<16x128xbf16, #tpu.memory_space<vmem>>, vector<16x128xbf16>
    tpu.vector_store %arg8[%c0_18, %c0_19], %25 {strides = array<i32>} : memref<16x128xbf16, #tpu.memory_space<vmem>>, vector<16x128xbf16>,
    return
  }
  func.func @transform_0(%arg0: i32) -> (i32, i32) {
    %c0_i32 = arith.constant 0 : i32
    %c0_i32_0 = arith.constant 0 : i32
    return %arg0, %c0_i32 : i32, i32
  }
  func.func @transform_1(%arg0: i32) -> (i32, i32) {
    %c0_i32 = arith.constant 0 : i32
    %c0_i32_0 = arith.constant 0 : i32
    %c0_i32_1 = arith.constant 0 : i32
    return %c0_i32, %c0_i32_0 : i32, i32
  }
  func.func @transform_2(%arg0: i32) -> (i32, i32) {
    %c0_i32 = arith.constant 0 : i32
    %c0_i32_0 = arith.constant 0 : i32
    %c0_i32_1 = arith.constant 0 : i32
    return %c0_i32, %c0_i32_0 : i32, i32
  }
  func.func @transform_3(%arg0: i32) -> (i32, i32) {
    %c0_i32 = arith.constant 0 : i32
    %c0_i32_0 = arith.constant 0 : i32
    %c0_i32_1 = arith.constant 0 : i32
    return %c0_i32, %c0_i32_0 : i32, i32
  }
  func.func @transform_4(%arg0: i32) -> (i32, i32) {
    %c0_i32 = arith.constant 0 : i32
    %c0_i32_0 = arith.constant 0 : i32
    %c0_i32_1 = arith.constant 0 : i32
    return %c0_i32, %c0_i32_0 : i32, i32
  }
  func.func @transform_5(%arg0: i32) -> (i32, i32) {
    %c0_i32 = arith.constant 0 : i32
    %c0_i32_0 = arith.constant 0 : i32
    %c0_i32_1 = arith.constant 0 : i32
    return %c0_i32, %c0_i32_0 : i32, i32
  }
  func.func @transform_6(%arg0: i32) -> (i32, i32) {
    %c0_i32 = arith.constant 0 : i32
    %c0_i32_0 = arith.constant 0 : i32
    %c0_i32_1 = arith.constant 0 : i32
    return %c0_i32, %c0_i32_0 : i32, i32
  }
  func.func @transform_7(%arg0: i32) -> (i32, i32) {
    %c0_i32 = arith.constant 0 : i32
    %c0_i32_0 = arith.constant 0 : i32
    return %arg0, %c0_i32 : i32, i32
  }
}

</mosaic_0001>

<bundles_post_ra>
// kernel: tpu_custom_call.1
= control target key start
LH: loop header
LB: loop body
LE: loop exit
PB: predicated region body
PF: predicated region fallthrough
CT: control target
= control target key end

     0   :  { %12 = vsyncpa [#allocation3], 0  ;;  %s1052_s0 = inlined_call_operand.hbm [shape: bf16[16,16], index: 0, kind: input, shape index: {}]   ;;  %s1053_s1 = inlined_call_operand.hbm [shape: bf16[16,256], index: 1, kind: input, shape index: {}]   ;;  %s1054_s2 = inlined_call_operand.vmem [shape: f32[1,256], index: 2, kind: input, shape index: {}]   ;;  %s1055_s3 = inlined_call_operand.hbm [shape: bf16[256,256], index: 3, kind: input, shape index: {}]   ;;  %s1056_s4 = inlined_call_operand.vmem [shape: f32[1,256], index: 4, kind: input, shape index: {}]   ;;  %s1057_s5 = inlined_call_operand.hbm [shape: bf16[256,128], index: 5, kind: input, shape index: {}]   ;;  %s1058_s6 = inlined_call_operand.vmem [shape: f32[1,128], index: 6, kind: input, shape index: {}]   ;;  %s1059_s7 = inlined_call_operand.hbm [shape: bf16[16,128], index: 7, kind: output, shape index: {}]  }
   0x1   :  { %13 = vsyncpa [#allocation6], 0 }
   0x2   :  { %14 = vsyncpa [#allocation9], 0 }
   0x3   :  { %15 = vsyncpa [#allocation4], 0  ;;  %s911_s24 = smov [#allocation5]   ;;  %s793_s28 = scalar_lea.hbm %s1053_s1, 256 }
   0x4   :  { %s33_s25 = sshll.u32 %s911_s24, 4  ;;  %p794_p0 = scmp.ne.s32.totalorder %s1053_s1, %s793_s28  ;;  %s34_s25 = int_to_ptr.vmem [resolvable:$true] %s33_s25 }
   0x5   :  { %p797_p1 = scmp.lt.u32.totalorder %s793_s28, %s1053_s1 }
   0x7   :  { %p799_p2 = pnand %p797_p1, %p794_p0 }
   0x9   :  { %802 = shalt.err (!%p799_p2)
}
   0xa   :  { %s803_s10 = scalar_lea.vmem %s34_s25, 256  ;;  %p808_p4 = scmp.lt.s32.totalorder %s34_s25, %s34_s25 }
   0xb   :  { %p804_p3 = scmp.ne.s32.totalorder %s34_s25, %s803_s10  ;;  %p809_p5 = scmp.lt.s32.totalorder %s803_s10, %s803_s10 }
   0xd   :  { %p810_p6 = por %p809_p5, %p808_p4 }
   0xf   :  { %p811_p7 = pnand %p810_p6, %p804_p3 }
  0x11   :  { %814 = shalt.err (!%p811_p7)
}
  0x12   :  { %s912_s11 = smov 128   ;;  %s913_s12 = smov 8  }
  0x13   :  { %39 = dma.hbm_to_vmem [thread:$0]  %s1053_s1, 256, %s34_s25, [#allocation6], %s912_s11, %s912_s11, %s913_s12  }
  0x14   :  { %s914_s15 = smov [#allocation2]   ;;  %s815_s19 = scalar_lea.hbm %s1052_s0, 128 }
  0x15   :  { %s21_s16 = sshll.u32 %s914_s15, 4  ;;  %p816_p8 = scmp.ne.s32.totalorder %s1052_s0, %s815_s19  ;;  %s22_s16 = int_to_ptr.vmem [resolvable:$true] %s21_s16 }
  0x16   :  { %p819_p9 = scmp.lt.u32.totalorder %s815_s19, %s1052_s0 }
  0x18   :  { %p821_p10 = pnand %p819_p9, %p816_p8 }
  0x1a   :  { %824 = shalt.err (!%p821_p10)
}
  0x1b   :  { %s825_s24 = scalar_lea.vmem %s22_s16, 128  ;;  %p830_p12 = scmp.lt.s32.totalorder %s22_s16, %s22_s16 }
  0x1c   :  { %p826_p11 = scmp.ne.s32.totalorder %s22_s16, %s825_s24  ;;  %p831_p13 = scmp.lt.s32.totalorder %s825_s24, %s825_s24 }
  0x1e   :  { %p832_p0 = por %p831_p13, %p830_p12 }
  0x20   :  { %p833_p1 = pnand %p832_p0, %p826_p11 }
  0x22   :  { %836 = shalt.err (!%p833_p1)
}
  0x23   :  { %s915_s1 = smov 64   ;;  %s916_s25 = smov 4  }
  0x24   :  { %27 = dma.hbm_to_vmem [thread:$0]  %s1052_s0, 128, %s22_s16, [#allocation3], %s915_s1, %s915_s1, %s916_s25  }
  0x25   :  { %s917_s28 = smov [#allocation7]   ;;  %s918_s30 = smov [#allocation8]  }
  0x26   :  { %s47_s29 = sshll.u32 %s917_s28, 4  ;;  %s61_s8 = sshll.u32 %s918_s30, 4  ;;  %s48_s29 = int_to_ptr.vmem [resolvable:$true] %s47_s29  ;;  %s991_s8 = int_to_ptr.vmem [resolvable:$true] %s61_s8 }
  0x27   :  { %s837_s13 = scalar_lea.hbm %s1055_s3, 4096 }
  0x28   :  { %p838_p2 = scmp.ne.s32.totalorder %s1055_s3, %s837_s13  ;;  %p841_p3 = scmp.lt.u32.totalorder %s837_s13, %s1055_s3 }
  0x2a   :  { %p843_p4 = pnand %p841_p3, %p838_p2 }
  0x2c   :  { %846 = shalt.err (!%p843_p4)
}
  0x2d   :  { %s847_s0 = scalar_lea.vmem %s48_s29, 4096  ;;  %p852_p6 = scmp.lt.s32.totalorder %s48_s29, %s48_s29 }
  0x2e   :  { %p848_p5 = scmp.ne.s32.totalorder %s48_s29, %s847_s0  ;;  %p853_p7 = scmp.lt.s32.totalorder %s847_s0, %s847_s0 }
  0x30   :  { %p854_p8 = por %p853_p7, %p852_p6 }
  0x32   :  { %p855_p9 = pnand %p854_p8, %p848_p5 }
  0x34   :  { %858 = shalt.err (!%p855_p9)
}
  0x35   :  { %53 = dma.hbm_to_vmem [thread:$0]  %s1055_s3, 4096, %s48_s29, [#allocation6], %s912_s11, %s912_s11, %s913_s12  }
  0x36   :  { %s859_s22 = scalar_lea.hbm %s1057_s5, 2048 }
  0x37   :  { %p860_p10 = scmp.ne.s32.totalorder %s1057_s5, %s859_s22  ;;  %p863_p11 = scmp.lt.u32.totalorder %s859_s22, %s1057_s5 }
  0x39   :  { %p865_p12 = pnand %p863_p11, %p860_p10 }
  0x3b   :  { %868 = shalt.err (!%p865_p12)
}
  0x3c   :  { %s869_s28 = scalar_lea.vmem %s991_s8, 2048  ;;  %p874_p0 = scmp.lt.s32.totalorder %s991_s8, %s991_s8 }
  0x3d   :  { %p870_p13 = scmp.ne.s32.totalorder %s991_s8, %s869_s28  ;;  %p875_p1 = scmp.lt.s32.totalorder %s869_s28, %s869_s28 }
  0x3f   :  { %p876_p2 = por %p875_p1, %p874_p0 }
  0x41   :  { %p877_p3 = pnand %p876_p2, %p870_p13 }
  0x43   :  { %880 = shalt.err (!%p877_p3)
}
  0x44   :  { %67 = dma.hbm_to_vmem [thread:$0]  %s1057_s5, 2048, %s991_s8, [#allocation9], %s915_s1, %s915_s1, %s916_s25  }
  0x45   :  { %903 = dma.done.wait [#allocation3], 128  }
  0x46   :  { %904 = vsyncadd [#allocation3], 4294967168 }
  0x47   :  { %905 = dma.done.wait [#allocation6], 4352  }
  0x48   :  { %906 = vsyncadd [#allocation6], 4294962944 }
  0x49   :  { %907 = dma.done.wait [#allocation9], 2048  }
  0x4a   :  { %908 = vsyncadd [#allocation9], 4294965248  ;;  %v919_v0 = vmov 0   ;;  %v721_v1 = vld [vmem:[#allocation5 + $0x4] ss:$8 sps:$4 sm:$0xff]   ;;  %v724_v3 = vld [vmem:[#allocation2] sm:$0xff]   ;;  %v89_v47 = vlaneseq }
  0x4b   :  { %150 = vmatprep.mubr.bf16.mxu0 %v919_v0  ;;  %v723_v2 = vld [vmem:[#allocation5] ss:$8 sps:$4 sm:$0xff]   ;;  %118 = vmatprep.subr.bf16.mxu0 %v721_v1  ;;  %vm114_vm0 = vcmask 130048   ;;  %v725_v4 = vld [vmem:[#allocation7 + $0x4] ss:$8 sps:$4 sm:$0xff]   ;;  %s920_s8 = smov [#allocation10]  }
  0x4c   :  { %119 = vmatpush1.bf16.msra.mxu0 %v723_v2  ;;  %v727_v5 = vld [vmem:[#allocation7] ss:$8 sps:$4 sm:$0xff]   ;;  %v728_v6 = vld [vmem:[#allocation7 + $0x14] ss:$8 sps:$4 sm:$0xff]   ;;  %371 = vmatprep.subr.bf16.mxu1 %v725_v4  ;;  %v730_v7 = vld [vmem:[#allocation7 + $0x10] ss:$8 sps:$4 sm:$0xff]  }
  0x4d   :  { %372 = vmatpush1.bf16.msra.mxu1 %v727_v5  ;;  %v731_v8 = vld [vmem:[#allocation7 + $0x24] ss:$8 sps:$4 sm:$0xff]   ;;  %v733_v9 = vld [vmem:[#allocation7 + $0x20] ss:$8 sps:$4 sm:$0xff]   ;;  %v734_v10 = vld [vmem:[#allocation7 + $0x34] ss:$8 sps:$4 sm:$0xff]  }
  0x4e   :  { %373 = vmatprep.subr.bf16.mxu1 %v728_v6  ;;  %v736_v11 = vld [vmem:[#allocation7 + $0x30] ss:$8 sps:$4 sm:$0xff]   ;;  %v737_v12 = vld [vmem:[#allocation7 + $0x44] ss:$8 sps:$4 sm:$0xff]   ;;  %v739_v13 = vld [vmem:[#allocation7 + $0x40] ss:$8 sps:$4 sm:$0xff]  }
  0x4f   :  { %630 = vmatmul.mubr.msk.bf16.vlgmr.msra.gmra.mrb[0].mxu0 %vm114_vm0, %v724_v3  ;;  %v740_v14 = vld [vmem:[#allocation7 + $0x54] ss:$8 sps:$4 sm:$0xff]   ;;  %v742_v15 = vld [vmem:[#allocation7 + $0x50] ss:$8 sps:$4 sm:$0xff]   ;;  %v743_v16 = vld [vmem:[#allocation7 + $0x64] ss:$8 sps:$4 sm:$0xff]  }
  0x50   :  { %v745_v17 = vld [vmem:[#allocation7 + $0x60] ss:$8 sps:$4 sm:$0xff]   ;;  %v746_v18 = vld [vmem:[#allocation7 + $0x74] ss:$8 sps:$4 sm:$0xff]   ;;  %v748_v19 = vld [vmem:[#allocation7 + $0x70] ss:$8 sps:$4 sm:$0xff]  }
  0x51   :  { %374 = vmatpush1.bf16.msra.mxu1 %v730_v7  ;;  %v749_v20 = vld [vmem:[#allocation7 + $0x84] ss:$8 sps:$4 sm:$0xff]   ;;  %v751_v21 = vld [vmem:[#allocation7 + $0x80] ss:$8 sps:$4 sm:$0xff]   ;;  %v752_v22 = vld [vmem:[#allocation7 + $0x94] ss:$8 sps:$4 sm:$0xff]  }
  0x52   :  { %375 = vmatprep.subr.bf16.mxu1 %v731_v8  ;;  %v754_v23 = vld [vmem:[#allocation7 + $0x90] ss:$8 sps:$4 sm:$0xff]   ;;  %v755_v24 = vld [vmem:[#allocation7 + $0xa4] ss:$8 sps:$4 sm:$0xff]   ;;  %v757_v25 = vld [vmem:[#allocation7 + $0xa0] ss:$8 sps:$4 sm:$0xff]  }
  0x53   :  { %v758_v26 = vld [vmem:[#allocation7 + $0xb4] ss:$8 sps:$4 sm:$0xff]   ;;  %v760_v27 = vld [vmem:[#allocation7 + $0xb0] ss:$8 sps:$4 sm:$0xff]   ;;  %v761_v28 = vld [vmem:[#allocation7 + $0xc4] ss:$8 sps:$4 sm:$0xff]  }
  0x54   :  { %v763_v29 = vld [vmem:[#allocation7 + $0xc0] ss:$8 sps:$4 sm:$0xff]   ;;  %v764_v30 = vld [vmem:[#allocation7 + $0xd4] ss:$8 sps:$4 sm:$0xff]   ;;  %v766_v31 = vld [vmem:[#allocation7 + $0xd0] ss:$8 sps:$4 sm:$0xff]  }
  0x55   :  { %376 = vmatpush1.bf16.msra.mxu1 %v733_v9  ;;  %v767_v32 = vld [vmem:[#allocation7 + $0xe4] ss:$8 sps:$4 sm:$0xff]   ;;  %v769_v33 = vld [vmem:[#allocation7 + $0xe0] ss:$8 sps:$4 sm:$0xff]   ;;  %v770_v34 = vld [vmem:[#allocation7 + $0xf4] ss:$8 sps:$4 sm:$0xff]  }
  0x56   :  { %377 = vmatprep.subr.bf16.mxu1 %v734_v10  ;;  %v772_v35 = vld [vmem:[#allocation7 + $0xf0] ss:$8 sps:$4 sm:$0xff]   ;;  %v773_v36 = vld [vmem:[#allocation8 + $0x40] sm:$0xff]   ;;  %v775_v38 = vld [vmem:[#allocation8 + $0x48] sm:$0xff]   ;;  %v90_v48 = vshrl.u32 %v89_v47, 7  ;;  %s613_s9 = sshll.u32 %s920_s8, 4  ;;  %s614_s9 = int_to_ptr.vmem [resolvable:$true] %s613_s9 }
  0x57   :  { %v774_v37 = vld [vmem:[#allocation8] sm:$0xff]   ;;  %689 = vmatprep.subr.bf16.mxu0 %v773_v36  ;;  %v776_v39 = vld [vmem:[#allocation8 + $0x8] sm:$0xff]   ;;  %v777_v40 = vld [vmem:[#allocation8 + $0x50] sm:$0xff]   ;;  %s881_s10 = scalar_lea.vmem %s614_s9, 128  ;;  %p886_p5 = scmp.lt.s32.totalorder %s614_s9, %s614_s9 }
  0x58   :  { %690 = vmatpush3.bf16.msra.mxu0 %v774_v37  ;;  %v778_v41 = vld [vmem:[#allocation8 + $0x10] sm:$0xff]   ;;  %v779_v42 = vld [vmem:[#allocation8 + $0x58] sm:$0xff]   ;;  %v781_v44 = vld [vmem:[#allocation8 + $0x60] sm:$0xff]   ;;  %v91_v49 = vsub.s32 0, %v90_v48  ;;  %v95_v51 = vsub.s32 1, %v90_v48  ;;  %p882_p4 = scmp.ne.s32.totalorder %s614_s9, %s881_s10  ;;  %p887_p6 = scmp.lt.s32.totalorder %s881_s10, %s881_s10 }
  0x59   :  { %378 = vmatpush1.bf16.msra.mxu1 %v736_v11  ;;  %691 = vmatprep.subr.bf16.mxu0 %v775_v38  ;;  %v780_v43 = vld [vmem:[#allocation8 + $0x18] sm:$0xff]   ;;  %v782_v45 = vld [vmem:[#allocation8 + $0x20] sm:$0xff]   ;;  %v783_v46 = vld [vmem:[#allocation8 + $0x68] sm:$0xff]  }
  0x5a   :  { %379 = vmatprep.subr.bf16.mxu1 %v737_v12  ;;  %v87_v50 = vld [vmem:[%s1054_s2] sm:$0x3]  ;;  %v785_v5 = vld [vmem:[#allocation8 + $0x70] sm:$0xff]   ;;  %v787_v7 = vld [vmem:[#allocation8 + $0x78] sm:$0xff]   ;;  %p888_p7 = por %p887_p6, %p886_p5 }
  0x5b   :  { %v92_v52 = vrot.slane %v87_v50, %v91_v49  ;;  %v96_v53 = vrot.slane %v87_v50, %v95_v51  ;;  %v784_v4 = vld [vmem:[#allocation8 + $0x28] sm:$0xff]   ;;  %v786_v6 = vld [vmem:[#allocation8 + $0x30] sm:$0xff]   ;;  %v788_v8 = vld [vmem:[#allocation8 + $0x38] sm:$0xff]  }
  0x5c   :  { %692 = vmatpush3.bf16.msra.mxu0 %v776_v39  ;;  %v199_v9 = vld [vmem:[%s1056_s4] sm:$0x3]  ;;  %p889_p8 = pnand %p888_p7, %p882_p4 }
  0x5d   :  { %380 = vmatpush1.bf16.msra.mxu1 %v739_v13  ;;  %693 = vmatprep.subr.bf16.mxu0 %v777_v40  ;;  %v204_v10 = vrot.slane %v199_v9, %v91_v49  ;;  %v208_v11 = vrot.slane %v199_v9, %v95_v51 }
  0x5e   :  { %381 = vmatprep.subr.bf16.mxu1 %v740_v14 }
  0x60   :  { %694 = vmatpush3.bf16.msra.mxu0 %v778_v41 }
  0x61   :  { %382 = vmatpush1.bf16.msra.mxu1 %v742_v15  ;;  %695 = vmatprep.subr.bf16.mxu0 %v779_v42 }
  0x62   :  { %383 = vmatprep.subr.bf16.mxu1 %v743_v16 }
  0x64   :  { %696 = vmatpush3.bf16.msra.mxu0 %v780_v43 }
  0x65   :  { %384 = vmatpush1.bf16.msra.mxu1 %v745_v17  ;;  %697 = vmatprep.subr.bf16.mxu0 %v781_v44 }
  0x66   :  { %385 = vmatprep.subr.bf16.mxu1 %v746_v18 }
  0x68   :  { %698 = vmatpush3.bf16.msra.mxu0 %v782_v45 }
  0x69   :  { %386 = vmatpush1.bf16.msra.mxu1 %v748_v19  ;;  %699 = vmatprep.subr.bf16.mxu0 %v783_v46 }
  0x6a   :  { %387 = vmatprep.subr.bf16.mxu1 %v749_v20 }
  0x6c   :  { %700 = vmatpush3.bf16.msra.mxu0 %v784_v4 }
  0x6d   :  { %388 = vmatpush1.bf16.msra.mxu1 %v751_v21  ;;  %701 = vmatprep.subr.bf16.mxu0 %v785_v5 }
  0x6e   :  { %389 = vmatprep.subr.bf16.mxu1 %v752_v22 }
  0x70   :  { %702 = vmatpush3.bf16.msra.mxu0 %v786_v6 }
  0x71   :  { %390 = vmatpush1.bf16.msra.mxu1 %v754_v23  ;;  %703 = vmatprep.subr.bf16.mxu0 %v787_v7 }
  0x72   :  { %391 = vmatprep.subr.bf16.mxu1 %v755_v24 }
  0x74   :  { %704 = vmatpush3.bf16.msra.mxu0 %v788_v8 }
  0x75   :  { %392 = vmatpush1.bf16.msra.mxu1 %v757_v25 }
  0x76   :  { %393 = vmatprep.subr.bf16.mxu1 %v758_v26 }
  0x79   :  { %394 = vmatpush1.bf16.msra.mxu1 %v760_v27  ;;  %v663_v27 = vld [vmem:[%s1058_s6] ss:$0 sm:$0xff] }
  0x7a   :  { %395 = vmatprep.subr.bf16.mxu1 %v761_v28 }
  0x7d   :  { %396 = vmatpush1.bf16.msra.mxu1 %v763_v29 }
  0x7e   :  { %397 = vmatprep.subr.bf16.mxu1 %v764_v30 }
  0x81   :  { %398 = vmatpush1.bf16.msra.mxu1 %v766_v31 }
  0x82   :  { %399 = vmatprep.subr.bf16.mxu1 %v767_v32 }
  0x85   :  { %400 = vmatpush1.bf16.msra.mxu1 %v769_v33 }
  0x86   :  { %401 = vmatprep.subr.bf16.mxu1 %v770_v34 }
  0x89   :  { %402 = vmatpush1.bf16.msra.mxu1 %v772_v35 }
 0x122   :  { %v152_v54 = vpop.f32.mrb[0].mxu0 }
 0x123   :  { %v153_v55 = vadd.f32 %v152_v54, %v92_v52  ;;  %v154_v56 = vpop.f32.mrb[1].mxu0 }
 0x124   :  { %v155_v57 = vadd.f32 %v154_v56, %v96_v53  ;;  %v156_v58 = vpop.f32.mrb[2].mxu0 }
 0x125   :  { %v157_v59 = vadd.f32 %v156_v58, %v92_v52  ;;  %v158_v60 = vpop.f32.mrb[3].mxu0  ;;  %v161_v62 = vmax.f32 %v153_v55, 0.0 }
 0x126   :  { %v159_v61 = vadd.f32 %v158_v60, %v96_v53  ;;  %v162_v0 = vmax.f32 %v155_v57, 0.0 }
 0x127   :  { %v163_v63 = vmax.f32 %v157_v59, 0.0 }
 0x128   :  { %v164_v1 = vmax.f32 %v159_v61, 0.0 }
 0x129   :  { %v165_v2 = vpack.c.bf16 %v163_v63, %v161_v62 }
 0x12a   :  { %v166_v3 = vpack.c.bf16 %v164_v1, %v162_v0 }
 0x12c   :  { %403 = vmatprep.mubr.bf16.mxu1 %v166_v3 }
 0x12d   :  { %404 = vmatmul.mubr.bf16.vlgmr.msra.gmra.mrb[0].mxu1 %v165_v2 }
 0x200   :  { %v405_v12 = vpop.f32.mrb[0].mxu1 }
 0x201   :  { %v406_v13 = vadd.f32 %v405_v12, %v204_v10  ;;  %v407_v14 = vpop.f32.mrb[1].mxu1 }
 0x202   :  { %v408_v15 = vadd.f32 %v407_v14, %v208_v11  ;;  %v409_v16 = vpop.f32.mrb[2].mxu1 }
 0x203   :  { %v410_v17 = vadd.f32 %v409_v16, %v204_v10  ;;  %v411_v18 = vpop.f32.mrb[3].mxu1  ;;  %v414_v20 = vmax.f32 %v406_v13, 0.0 }
 0x204   :  { %v412_v19 = vadd.f32 %v411_v18, %v208_v11  ;;  %v415_v22 = vmax.f32 %v408_v15, 0.0 }
 0x205   :  { %v416_v21 = vmax.f32 %v410_v17, 0.0 }
 0x206   :  { %v417_v23 = vmax.f32 %v412_v19, 0.0 }
 0x207   :  { %v418_v24 = vpack.c.bf16 %v416_v21, %v414_v20 }
 0x208   :  { %v419_v25 = vpack.c.bf16 %v417_v23, %v415_v22 }
 0x20a   :  { %587 = vmatprep.mubr.bf16.mxu0 %v419_v25 }
 0x20b   :  { %588 = vmatmul.mubr.bf16.vlgmr.msra.gmra.mrb[4].mxu0 %v418_v24 }
 0x2de   :  { %v705_v26 = vpop.f32.mrb[4].mxu0 }
 0x2df   :  { %v706_v28 = vpop.f32.mrb[5].mxu0 }
 0x2e0   :  { %v707_v29 = vadd.f32 %v706_v28, %v705_v26  ;;  %v708_v30 = vpop.f32.mrb[6].mxu0 }
 0x2e1   :  { %v709_v31 = vpop.f32.mrb[7].mxu0 }
 0x2e2   :  { %v590_v32 = vadd.f32 %v707_v29, %v663_v27  ;;  %v710_v33 = vadd.f32 %v709_v31, %v708_v30 }
 0x2e4   :  { %v593_v34 = vadd.f32 %v710_v33, %v663_v27  ;;  %789 = vtanh.f32 %v590_v32 }
 0x2e6   :  { %791 = vtanh.f32 %v593_v34 }
 0x2ee   :  { %v790_v35 = vpop.eup %789 }
 0x2f0   :  { %v792_v36 = vpop.eup %791 }
 0x2f1   :  { %v687_v37 = vpack.c.bf16 %v792_v36, %v790_v35 }
 0x2f3   :  { %688 = vst [vmem:[#allocation10] sm:$0xff] %v687_v37  }
 0x2f4   :  { %892 = shalt.err (!%p889_p8)
}
 0x2f5   :  { %s893_s14 = scalar_lea.hbm %s1059_s7, 128 }
 0x2f6   :  { %p894_p9 = scmp.ne.s32.totalorder %s1059_s7, %s893_s14  ;;  %p897_p10 = scmp.lt.u32.totalorder %s893_s14, %s1059_s7 }
 0x2f8   :  { %p899_p11 = pnand %p897_p10, %p894_p9 }
 0x2fa   :  { %902 = shalt.err (!%p899_p11)
}
 0x2fb   :  { %619 = dma.vmem_to_hbm [thread:$0]  %s614_s9, 128, %s1059_s7, [#allocation4], %s915_s1, %s915_s1, %s916_s25  }
 0x2fc   :  { %909 = dma.done.wait [#allocation4], 128  }
 0x2fd   :  { %910 = vsyncadd [#allocation4], 4294967168 }
 0x2fe   :  { %623 = vsyncpa [#allocation3], 1 }
 0x2ff   :  { %624 = vsyncpa [#allocation6], 1 }
 0x300   :  { %625 = vsyncpa [#allocation9], 1 }
 0x301   :  { %626 = vsyncpa [#allocation4], 1 }

</bundles_post_ra>
